<compile_context>
chip_gen: v5e
topology: v5e:2x2
jax: 0.10.0
libtpu: 0.0.40
codegen_flags: <defaults>
</compile_context>

<pallas_src>
import math

import jax
import jax.numpy as jnp
from jax.experimental import pallas as pl
from jax.experimental.pallas import tpu as pltpu

# GCNLayer is instantiated with a LeakyReLU activation (act=None would crash
# torch's calculate_gain in __init__), so we use leaky_relu with this slope
# both for the activation and for the xavier_uniform gain.
NEG_SLOPE = 0.2


def _round_up(v, m):
    return (v + m - 1) // m * m


def _pick_bt(batch, n):
    """Pick a batch tile: >=2 grid steps (megacore on v7x) and bt*N >= 256 rows
    (fills the 256-wide MXU on v6e/v7x; >=128 already fills v5e)."""
    if batch == 1:
        return 1
    divisors = [d for d in range(1, batch) if batch % d == 0 and d <= batch // 2]
    good = [d for d in divisors if d * n >= 256]
    return min(good) if good else max(divisors)


def gcn_layer_kernel(x_ref, wt_ref, a_ref, o_ref):
    # x_ref:  (bt*N, F_in)        batch tile of node features (bf16, unpadded F_in)
    # wt_ref: (F_in, F_out_p)     pre-transposed, F_out-padded linear weight (bf16)
    # a_ref:  (bt*N, bt*N)        kron(I_bt, adj + Identity) block-diag propagation (bf16)
    # o_ref:  (bt*N, F_out_p)     lane-dense output tile (f32)
    #
    # h = LeakyReLU(x @ W^T) computed once per tile (shared between the two
    # GCNConv calls of the original module); f32 accumulation + f32 activation.
    h = jnp.dot(x_ref[...], wt_ref[...], preferred_element_type=jnp.float32)
    h = jnp.where(h >= 0, h, NEG_SLOPE * h)
    # Single MXU-filling propagation matmul for the whole batch tile
    # (block-diagonal adjacency replaces bt tiny (N,N)@(N,F) matmuls).
    out = jnp.dot(a_ref[...], h.astype(a_ref.dtype),
                  preferred_element_type=jnp.float32)
    o_ref[...] = out.astype(o_ref.dtype)


def gcn_layer(x, adj, identity, w, *, bt=None):
    B, N, Fin = x.shape
    Fout, Fin_w = w.shape
    assert Fin_w == Fin
    if bt is None:
        bt = _pick_bt(B, N)
    assert B % bt == 0
    assert (bt * N) % 8 == 0, "bt*N must be a multiple of 8 (sublane tile)"
    G = B // bt
    fout_p = _round_up(Fout, 128)
    compute_dtype = jnp.bfloat16  # MXU operands; accumulation stays f32

    # Fold the Identity GCNConv into the adjacency: adj@h + I@h == (adj+I)@h,
    # then batch bt graphs into one block-diagonal propagation matrix so the
    # per-tile propagation is a single (bt*N, bt*N) @ (bt*N, F_out_p) matmul.
    adj_hat = (adj + identity).astype(jnp.float32)
    a_blk = jnp.kron(jnp.eye(bt, dtype=jnp.float32), adj_hat).astype(compute_dtype)

    # Pre-transposed weight; pad only F_out to 128 (lane-dense stores).
    # F_in is left unpadded (full-array last dim is a legal BlockSpec dim) to
    # avoid multiplying input HBM/DMA traffic.
    w_t = jnp.pad(w.T.astype(compute_dtype), ((0, 0), (0, fout_p - Fout)))
    x2d = x.reshape(B * N, Fin).astype(compute_dtype)

    # TODO(synk): for realistic graph sizes (N in the thousands) the resident
    # (N,N) adjacency and the block-diagonal trick no longer fit VMEM
    # (v7x: 64 MiB physical / 32 MiB scoped default vs 128 MiB on v5e/v6e).
    # Switch to a 2-D grid: row-tile adj_hat ("parallel") x an "arbitrary"
    # reduction axis tiling adj columns / h rows, with an f32 VMEM accumulator
    # (pl.when init on k==0, store on k==last), keep adj_hat in bf16, and set
    # vmem_limit_bytes via pltpu.CompilerParams budgeting 2x per pipelined block.
    out2d = pl.pallas_call(
        gcn_layer_kernel,
        out_shape=jax.ShapeDtypeStruct((B * N, fout_p), x.dtype),
        grid_spec=pltpu.PrefetchScalarGridSpec(
            num_scalar_prefetch=0,
            grid=(G,),
            in_specs=[
                pl.BlockSpec((bt * N, Fin), lambda i: (i, 0)),
                pl.BlockSpec((Fin, fout_p), lambda i: (0, 0)),
                pl.BlockSpec((bt * N, bt * N), lambda i: (0, 0)),
            ],
            out_specs=pl.BlockSpec((bt * N, fout_p), lambda i: (i, 0)),
        ),
        compiler_params=pltpu.CompilerParams(
            dimension_semantics=("parallel",)),
    )(x2d, w_t, a_blk)

    # Drop the F_out padding only if it exists (avoids an extra HBM round-trip
    # when F_out is already a multiple of 128).
    out2d = out2d if fout_p == Fout else out2d[:, :Fout]
    return out2d.reshape(B, N, Fout)


def xavier_uniform(key, shape, gain):
    # nn.init.xavier_uniform_ on nn.Linear.weight of shape (fan_out, fan_in)
    fan_out, fan_in = shape
    a = gain * math.sqrt(6.0 / (fan_in + fan_out))
    return jax.random.uniform(key, shape, jnp.float32, -a, a)


if __name__ == "__main__":
    key = jax.random.PRNGKey(0)
    kx, kadj, kw = jax.random.split(key, 3)

    # Small but MXU-meaningful: bt auto-picks 32 -> bt*N = 256 rows, grid = 2.
    B, N, Fin, Fout = 64, 8, 16, 32
    x = jax.random.normal(kx, (B, N, Fin), dtype=jnp.float32)
    adj = jax.random.uniform(kadj, (N, N), dtype=jnp.float32)
    identity = jnp.eye(N, dtype=jnp.float32)

    # gain = nn.init.calculate_gain('leaky_relu', NEG_SLOPE)
    gain = math.sqrt(2.0 / (1.0 + NEG_SLOPE ** 2))
    w = xavier_uniform(kw, (Fout, Fin), gain)

    out = jax.block_until_ready(gcn_layer(x, adj, identity, w))

    # pure-JAX f32 reference of the PyTorch forward (kernel uses bf16 MXU
    # operands with f32 accumulation -> loosened tolerance).
    h = x @ w.T
    h = jnp.where(h >= 0, h, NEG_SLOPE * h)
    ref = jnp.einsum("nm,bmf->bnf", adj, h) + jnp.einsum("nm,bmf->bnf", identity, h)
    assert out.shape == (B, N, Fout)
    assert jnp.allclose(out, ref, atol=5e-2, rtol=5e-2), "kernel/reference mismatch"

    print("KERNEL_OK")
</pallas_src>

<mosaic_0001>
module attributes {stable_mosaic.version = 11 : i64} {
  func.func @gcn_layer_kernel(%arg0: i32, %arg1: memref<256x16xbf16, #tpu.memory_space<vmem>>, %arg2: memref<16x128xbf16, #tpu.memory_space<vmem>>, %arg3: memref<256x256xbf16, #tpu.memory_space<vmem>>, %arg4: memref<256x128xf32, #tpu.memory_space<vmem>>) attributes {dimension_semantics = [#tpu.dimension_semantics<parallel>], iteration_bounds = array<i64: 2>, scalar_prefetch = 0 : i64, scratch_operands = 0 : i64, tpu.core_type = #tpu.core_type<tc>, window_params = [{transform_indices = @transform_0, window_bounds = array<i64: 256, 16>}, {pipeline_mode = #tpu.pipeline_mode<synchronous>, transform_indices = @transform_1, window_bounds = array<i64: 16, 128>}, {pipeline_mode = #tpu.pipeline_mode<synchronous>, transform_indices = @transform_2, window_bounds = array<i64: 256, 256>}, {transform_indices = @transform_3, window_bounds = array<i64: 256, 128>}]} {
    %c0 = arith.constant 0 : index
    %c0_0 = arith.constant 0 : index
    %0 = vector.load %arg1[%c0, %c0_0] : memref<256x16xbf16, #tpu.memory_space<vmem>>, vector<256x16xbf16>
    %c0_1 = arith.constant 0 : index
    %c0_2 = arith.constant 0 : index
    %1 = vector.load %arg2[%c0_1, %c0_2] : memref<16x128xbf16, #tpu.memory_space<vmem>>, vector<16x128xbf16>
    %cst = arith.constant dense<0.000000e+00> : vector<256x128xf32>
    %2 = tpu.matmul %0, %1, %cst {dimension_numbers = #tpu.dot_dimension_numbers<[1], [0], [0], [1], [0, 0, 1, 1], [], []>} : vector<256x16xbf16>, vector<16x128xbf16>, vector<256x128xf32> -> vector<256x128xf32>
    %cst_3 = arith.constant 0.000000e+00 : f32
    %3 = vector.broadcast %cst_3 : f32 to vector<256x128xf32>
    %4 = arith.cmpf oge, %2, %3 : vector<256x128xf32>
    %cst_4 = arith.constant 2.000000e-01 : f32
    %5 = vector.broadcast %cst_4 : f32 to vector<256x128xf32>
    %6 = arith.mulf %5, %2 : vector<256x128xf32>
    %7 = arith.select %4, %2, %6 : vector<256x128xi1>, vector<256x128xf32>
    %c0_5 = arith.constant 0 : index
    %c0_6 = arith.constant 0 : index
    %8 = vector.load %arg3[%c0_5, %c0_6] : memref<256x256xbf16, #tpu.memory_space<vmem>>, vector<256x256xbf16>
    %9 = arith.truncf %7 : vector<256x128xf32> to vector<256x128xbf16>
    %cst_7 = arith.constant dense<0.000000e+00> : vector<256x128xf32>
    %10 = tpu.matmul %8, %9, %cst_7 {dimension_numbers = #tpu.dot_dimension_numbers<[1], [0], [0], [1], [0, 0, 1, 1], [], []>} : vector<256x256xbf16>, vector<256x128xbf16>, vector<256x128xf32> -> vector<256x128xf32>
    %c0_8 = arith.constant 0 : index
    %c0_9 = arith.constant 0 : index
    %11 = vector.load %arg4[%c0_8, %c0_9] : memref<256x128xf32, #tpu.memory_space<vmem>>, vector<256x128xf32>
    tpu.vector_store %arg4[%c0_8, %c0_9], %10 {strides = array<i32>} : memref<256x128xf32, #tpu.memory_space<vmem>>, vector<256x128xf32>,
    return
  }
  func.func @transform_0(%arg0: i32) -> (i32, i32) {
    %c0_i32 = arith.constant 0 : i32
    %c0_i32_0 = arith.constant 0 : i32
    return %arg0, %c0_i32 : i32, i32
  }
  func.func @transform_1(%arg0: i32) -> (i32, i32) {
    %c0_i32 = arith.constant 0 : i32
    %c0_i32_0 = arith.constant 0 : i32
    %c0_i32_1 = arith.constant 0 : i32
    return %c0_i32, %c0_i32_0 : i32, i32
  }
  func.func @transform_2(%arg0: i32) -> (i32, i32) {
    %c0_i32 = arith.constant 0 : i32
    %c0_i32_0 = arith.constant 0 : i32
    %c0_i32_1 = arith.constant 0 : i32
    return %c0_i32, %c0_i32_0 : i32, i32
  }
  func.func @transform_3(%arg0: i32) -> (i32, i32) {
    %c0_i32 = arith.constant 0 : i32
    %c0_i32_0 = arith.constant 0 : i32
    return %arg0, %c0_i32 : i32, i32
  }
}

</mosaic_0001>

<bundles_post_ra>
// kernel: tpu_custom_call.1
= control target key start
LH: loop header
LB: loop body
LE: loop exit
PB: predicated region body
PF: predicated region fallthrough
CT: control target
= control target key end

     0   :  { %8 = vsyncpa [#allocation3], 0  ;;  %s1850_s0 = inlined_call_operand.vmem [shape: bf16[512,16], index: 0, kind: input, shape index: {}]   ;;  %s1851_s1 = inlined_call_operand.vmem [shape: bf16[16,128], index: 1, kind: input, shape index: {}]   ;;  %s1852_s2 = inlined_call_operand.vmem [shape: bf16[256,256], index: 2, kind: input, shape index: {}]   ;;  %s1853_s3 = inlined_call_operand.hbm [shape: f32[512,128], index: 3, kind: output, shape index: {}]  }
   0x1   :  { %10 = vsyncpa [#allocation3 + $0x1], 0  ;;  %s1441_s12 = smov 0   ;;  %s1443_s13 = smov 0  }
   0x2   :  { %s1445_s14 = smov 0   ;;  %s1447_s15 = smov 0  }
   0x3 LB: > { %s1462_s16 = sadd.s32 4294967295, %s1417_s15   ;;  %s1023_s17 = sadd.s32 4294967294, %s1417_s15   ;;  %s1417_s15 = sphi %s1447_s15, %s1859_s15   ;;  %s1413_s14 = sphi %s1445_s14, %s1858_s14   ;;  %s1409_s13 = sphi %s1443_s13, %s1857_s13   ;;  %s1405_s12 = sphi %s1441_s12, %s1856_s12  }
   0x4   : > { %s1466_s18 = sadd.s32 1, %s1417_s15   ;;  %s91_s19 = sadd.s32 1, %s1413_s14 }
   0x5   : > { %s88_s20 = ssub.s32 %s1417_s15, %s1466_s18  ;;  %p101_p0 = scmp.ne.s32.totalorder %s1413_s14, %s1409_s13 }
   0x6   : > { %p89_p1 = scmp.eq.s32.totalorder %s88_s20, 0  ;;  %p102_p2 = scmp.eq.s32.totalorder %s1462_s16, 1 }
   0x7   : > { %p107_p3 = scmp.ne.s32.totalorder %s1409_s13, %s1405_s12  ;;  %p108_p4 = scmp.eq.s32.totalorder %s1023_s17, 1 }
   0x8   : > { %s1477_s21 = scalar_select %p89_p1, %s1413_s14, %s91_s19  }
   0x9   : > { %p1479_p5 = por %p102_p2, %p101_p0  ;;  %p1483_p6 = por %p108_p4, %p107_p3 }
   0xa   : > { %p1026_p7 = scmp.ge.s32.totalorder %s1417_s15, 1  ;;  %p141_p8 = scmp.lt.s32.totalorder %s1417_s15, 3 }
   0xc   : > { %p142_p9 = pnand %p1026_p7, %p141_p8 }
   0xd   : > { %s1028_s26 = sshll.u32 (!%p142_p9), %s1462_s16, 5  ;;  %s162_s8 = sand.u32 (!%p142_p9), 1, %s1409_s13  }
   0xe   : > { %145 = sbr.rel (%p142_p9) target bundleno = 695 (0x2b7), region = 32  ;;  %p166_p10 = scmp.lt.s32.totalorder (!%p142_p9), %s1028_s26, 63 }
   0xf   : > { %s1027_s9 = sshll.u32 (!%p142_p9), %s162_s8, 8  ;;  %s1296_s11 = sshll.u32 (!%p142_p9), %s1462_s16, 8 }
  0x10   : > { %s1750_s10 = scalar_lea.vmem (!%p142_p9), [#allocation2], %s1027_s9  ;;  %s957_s20 = scalar_lea.hbm (!%p142_p9), %s1853_s3, %s1296_s11 }
  0x11   : > { %s958_s24 = sshll.u32 (!%p142_p9), %s1750_s10, 4  ;;  %s960_s25 = sshll.u32 (!%p142_p9), %s957_s20, 4  ;;  %s959_s24 = int_to_ptr.vmem [resolvable:$true] %s958_s24  ;;  %s961_s25 = int_to_ptr.hbm [resolvable:$true] %s960_s25 }
  0x13   : > { %v1263_v0 = vld [vmem:[%s1851_s1] sm:$0xff]  ;;  %s1861_s26 = smov (!%p166_p10, %s1028_s26), 63  ;;  %vm293_vm0 = vcmask 130048  }
  0x14   : > { %349 = vmatpush.bf16.msra.mxu0 %v1263_v0  ;;  %1297 = vmatpush.bf16.msra.mxu3 %v1263_v0  ;;  %s1029_s27 = sshll.u32 %s1861_s26, 2  ;;  %s946_s26 = scalar_lea.sflag [#allocation3], %s162_s8 }
  0x15   : > { %s1496_s30 = scalar_lea.vmem %s1850_s0, %s1029_s27  ;;  %s1369_s27 = sshra.s32 %s961_s25, 4  ;;  %s1370_s27 = int_to_ptr.hbm [resolvable:$true] %s1369_s27 }
  0x16   : > { %v1247_v1 = vld [vmem:[%s1496_s30] sm:$0xff]  ;;  %v1248_v2 = vld [vmem:[%s1496_s30 + $0x8] sm:$0xff]  ;;  %v1249_v3 = vld [vmem:[%s1496_s30 + $0x10] sm:$0xff]  ;;  %s1371_s16 = scalar_lea.hbm %s1370_s27, 256  ;;  %p1376_p0 = scmp.lt.s32.totalorder %s1370_s27, %s1853_s3 }
  0x17   : > { %1098 = vmatmul.msk.bf16.vlgmr.msra.gmra.mxu0 %vm293_vm0, %v1247_v1  ;;  %v1250_v4 = vld [vmem:[%s1496_s30 + $0x18] sm:$0xff]  ;;  %v1260_v5 = vld [vmem:[%s1496_s30 + $0x68] sm:$0xff]  ;;  %v1251_v6 = vld [vmem:[%s1496_s30 + $0x20] sm:$0xff]  ;;  %p1372_p11 = scmp.ne.s32.totalorder %s1370_s27, %s1371_s16 }
  0x18   : > { %1111 = vmatmul.msk.bf16.vlgmr.msra.gmra.mxu3 %vm293_vm0, %v1260_v5  ;;  %v1261_v7 = vld [vmem:[%s1496_s30 + $0x70] sm:$0xff]  ;;  %v1252_v8 = vld [vmem:[%s1496_s30 + $0x28] sm:$0xff]  ;;  %v1262_v9 = vld [vmem:[%s1496_s30 + $0x78] sm:$0xff] }
  0x19   : > { %v1253_v10 = vld [vmem:[%s1496_s30 + $0x30] sm:$0xff]  ;;  %v1254_v11 = vld [vmem:[%s1496_s30 + $0x38] sm:$0xff]  ;;  %v1255_v12 = vld [vmem:[%s1496_s30 + $0x40] sm:$0xff]  ;;  %p1373_p12 = pnand %p1372_p11, %p1479_p5 }
  0x1a   : > { %v1256_v20 = vld [vmem:[%s1496_s30 + $0x48] sm:$0xff]  ;;  %v1257_v28 = vld [vmem:[%s1496_s30 + $0x50] sm:$0xff]  ;;  %v1258_v36 = vld [vmem:[%s1496_s30 + $0x58] sm:$0xff] }
  0x1b   : > { %v1259_v44 = vld [vmem:[%s1496_s30 + $0x60] sm:$0xff]  ;;  %p1374_p13 = pneg %p1373_p12  ;;  %s1375_s30 = scalar_lea.hbm %s1853_s3, 512 }
  0x1c   : > { %p1377_p1 = scmp.lt.s32.totalorder %s1375_s30, %s1371_s16 }
  0x1e   : > { %p1378_p2 = por %p1377_p1, %p1376_p0 }
  0x20   : > { %p1379_p3 = pnand %p1378_p2, %p1374_p13 }
  0x27   : > { %1099 = vmatmul.msk.bf16.gmra.mxu0 %vm293_vm0, %v1248_v2 }
  0x28   : > { %1112 = vmatmul.msk.bf16.gmra.mxu3 %vm293_vm0, %v1261_v7 }
  0x37   : > { %1100 = vmatmul.msk.bf16.gmra.mxu0 %vm293_vm0, %v1249_v3 }
  0x38   : > { %1113 = vmatmul.msk.bf16.gmra.mxu3 %vm293_vm0, %v1262_v9 }
  0x47   : > { %1101 = vmatmul.msk.bf16.gmra.mxu0 %vm293_vm0, %v1250_v4 }
  0x57   : > { %1102 = vmatmul.msk.bf16.gmra.mxu0 %vm293_vm0, %v1251_v6 }
  0x67   : > { %1103 = vmatmul.msk.bf16.gmra.mxu0 %vm293_vm0, %v1252_v8 }
  0x77   : > { %1104 = vmatmul.msk.bf16.gmra.mxu0 %vm293_vm0, %v1253_v10 }
  0x87   : > { %1105 = vmatmul.msk.bf16.gmra.mxu0 %vm293_vm0, %v1254_v11 }
  0x94   : > { %v351_v13 = vpop.f32.mrf.mxu0 }
  0x95   : > { %v463_v14 = vmul.f32 0.2, %v351_v13  ;;  %vm431_vm1 = vcmp.ge.f32.partialorder %v351_v13, 0.0 }
  0x97   : > { %1106 = vmatmul.msk.bf16.gmra.mxu0 %vm293_vm0, %v1255_v12  ;;  %v495_v17 = vsel %vm431_vm1, %v351_v13, %v463_v14 }
  0x9b   : > { %v416_v46 = vpop.f32.mrf.mxu3 }
  0x9c   : > { %v353_v15 = vpop.f32.mrf.mxu0  ;;  %v489_v1 = vmul.f32 0.2, %v416_v46  ;;  %vm457_vm13 = vcmp.ge.f32.partialorder %v416_v46, 0.0 }
  0x9d   : > { %v464_v16 = vmul.f32 0.2, %v353_v15  ;;  %vm432_vm2 = vcmp.ge.f32.partialorder %v353_v15, 0.0 }
  0x9e   : > { %v521_v6 = vsel %vm457_vm13, %v416_v46, %v489_v1 }
  0x9f   : > { %v496_v18 = vsel %vm432_vm2, %v353_v15, %v464_v16 }
  0xa0   : > { %v1522_v19 = vpack.c.bf16 %v496_v18, %v495_v17 }
  0xa3   : > { %v418_v48 = vpop.f32.mrf.mxu3 }
  0xa4   : > { %v356_v21 = vpop.f32.mrf.mxu0  ;;  %v490_v2 = vmul.f32 0.2, %v418_v48  ;;  %vm458_vm14 = vcmp.ge.f32.partialorder %v418_v48, 0.0 }
  0xa5   : > { %v465_v22 = vmul.f32 0.2, %v356_v21  ;;  %vm433_vm3 = vcmp.ge.f32.partialorder %v356_v21, 0.0 }
  0xa6   : > { %v522_v7 = vsel %vm458_vm14, %v418_v48, %v490_v2 }
  0xa7   : > { %1107 = vmatmul.msk.bf16.gmra.mxu0 %vm293_vm0, %v1256_v20  ;;  %v497_v25 = vsel %vm433_vm3, %v356_v21, %v465_v22  ;;  %v572_v8 = vpack.c.bf16 %v522_v7, %v521_v6  ;;  %v1228_v7 = vld [vmem:[%s1852_s2 + $0xe0] sm:$0xf] }
  0xab   : > { %v421_v50 = vpop.f32.mrf.mxu3 }
  0xac   : > { %v358_v23 = vpop.f32.mrf.mxu0  ;;  %v491_v59 = vmul.f32 0.2, %v421_v50  ;;  %vm459_vm11 = vcmp.ge.f32.partialorder %v421_v50, 0.0 }
  0xad   : > { %vm434_vm4 = vcmp.ge.f32.partialorder %v358_v23, 0.0  ;;  %v466_v24 = vmul.f32 0.2, %v358_v23 }
  0xae   : > { %v523_v3 = vsel %vm459_vm11, %v421_v50, %v491_v59  ;;  %v1220_v50 = vld [vmem:[%s1852_s2 + $0xd0] sm:$0xf] }
  0xaf   : > { %v498_v26 = vsel %vm434_vm4, %v358_v23, %v466_v24 }
  0xb0   : > { %v1526_v27 = vpack.c.bf16 %v498_v26, %v497_v25 }
  0xb3   : > { %v423_v52 = vpop.f32.mrf.mxu3 }
  0xb4   : > { %v361_v29 = vpop.f32.mrf.mxu0  ;;  %v492_v60 = vmul.f32 0.2, %v423_v52  ;;  %vm460_vm12 = vcmp.ge.f32.partialorder %v423_v52, 0.0 }
  0xb5   : > { %v467_v30 = vmul.f32 0.2, %v361_v29  ;;  %vm435_vm5 = vcmp.ge.f32.partialorder %v361_v29, 0.0 }
  0xb6   : > { %v524_v4 = vsel %vm460_vm12, %v423_v52, %v492_v60 }
  0xb7   : > { %1108 = vmatmul.msk.bf16.gmra.mxu0 %vm293_vm0, %v1257_v28  ;;  %v499_v33 = vsel %vm435_vm5, %v361_v29, %v467_v30  ;;  %v573_v5 = vpack.c.bf16 %v524_v4, %v523_v3 }
  0xbb   : > { %v426_v54 = vpop.f32.mrf.mxu3 }
  0xbc   : > { %v363_v31 = vpop.f32.mrf.mxu0  ;;  %v493_v56 = vmul.f32 0.2, %v426_v54  ;;  %vm461_vm9 = vcmp.ge.f32.partialorder %v426_v54, 0.0 }
  0xbd   : > { %vm436_vm6 = vcmp.ge.f32.partialorder %v363_v31, 0.0  ;;  %v468_v32 = vmul.f32 0.2, %v363_v31 }
  0xbe   : > { %v525_v61 = vsel %vm461_vm9, %v426_v54, %v493_v56  ;;  %v1267_v56 = vld [vmem:[%s1852_s2 + $0x14] sm:$0xf0] }
  0xbf   : > { %v500_v34 = vsel %vm436_vm6, %v363_v31, %v468_v32 }
  0xc0   : > { %v1530_v35 = vpack.c.bf16 %v500_v34, %v499_v33 }
  0xc3   : > { %v428_v57 = vpop.f32.mrf.mxu3 }
  0xc4   : > { %v366_v37 = vpop.f32.mrf.mxu0  ;;  %vm462_vm10 = vcmp.ge.f32.partialorder %v428_v57, 0.0  ;;  %v494_v58 = vmul.f32 0.2, %v428_v57 }
  0xc5   : > { %v469_v38 = vmul.f32 0.2, %v366_v37  ;;  %vm437_vm7 = vcmp.ge.f32.partialorder %v366_v37, 0.0 }
  0xc6   : > { %v526_v62 = vsel %vm462_vm10, %v428_v57, %v494_v58 }
  0xc7   : > { %1109 = vmatmul.msk.bf16.gmra.mxu0 %vm293_vm0, %v1258_v36  ;;  %v501_v41 = vsel %vm437_vm7, %v366_v37, %v469_v38  ;;  %v1542_v63 = vpack.c.bf16 %v526_v62, %v525_v61 }
  0xc9   : > { %824 = vmatpush.bf16.msra.mxu2 %v1542_v63 }
  0xcc   : > { %v368_v39 = vpop.f32.mrf.mxu0 }
  0xcd   : > { %vm438_vm8 = vcmp.ge.f32.partialorder %v368_v39, 0.0  ;;  %v470_v40 = vmul.f32 0.2, %v368_v39  ;;  %825 = vmatpush.bf16.msra.mxu2 %v573_v5 }
  0xcf   : > { %v502_v42 = vsel %vm438_vm8, %v368_v39, %v470_v40 }
  0xd0   : > { %v1534_v43 = vpack.c.bf16 %v502_v42, %v501_v41 }
  0xd1   : > { %826 = vmatpush.bf16.msra.mxu2 %v572_v8 }
  0xd4   : > { %v1537_v45 = vpop.f32.mrf.mxu0 }
  0xd5   : > { %v471_v26 = vmul.f32 0.2, %v1537_v45  ;;  %vm439_vm6 = vcmp.ge.f32.partialorder %v1537_v45, 0.0 }
  0xd7   : > { %1110 = vmatmul.msk.bf16.gmra.mxu0 %vm293_vm0, %v1259_v44  ;;  %v503_v32 = vsel %vm439_vm6, %v1537_v45, %v471_v26  ;;  %v1140_v26 = vld [vmem:[%s1852_s2 + $0x30] sm:$0xf] }
  0xdc   : > { %v1540_v47 = vpop.f32.mrf.mxu0 }
  0xdd   : > { %v472_v24 = vmul.f32 0.2, %v1540_v47  ;;  %vm440_vm5 = vcmp.ge.f32.partialorder %v1540_v47, 0.0 }
  0xdf   : > { %v504_v30 = vsel %vm440_vm5, %v1540_v47, %v472_v24  ;;  %v1265_v47 = vld [vmem:[%s1852_s2 + $0x4] sm:$0xf0]  ;;  %v1295_v24 = vld [vmem:[%s1852_s2 + $0xf4] sm:$0xf0] }
  0xe0   : > { %v563_v34 = vpack.c.bf16 %v504_v30, %v503_v32  ;;  %v1126_v30 = vld [vmem:[%s1852_s2 + $0x18] sm:$0xf0] }
  0xe4   : > { %v376_v49 = vpop.f32.mrf.mxu0 }
  0xe5   : > { %v473_v20 = vmul.f32 0.2, %v376_v49  ;;  %vm441_vm4 = vcmp.ge.f32.partialorder %v376_v49, 0.0 }
  0xe7   : > { %v505_v28 = vsel %vm441_vm4, %v376_v49, %v473_v20  ;;  %v1118_v20 = vld [vmem:[%s1852_s2 + $0x8] sm:$0xf0] }
  0xec   : > { %v378_v51 = vpop.f32.mrf.mxu0 }
  0xed   : > { %v474_v17 = vmul.f32 0.2, %v378_v51  ;;  %vm442_vm3 = vcmp.ge.f32.partialorder %v378_v51, 0.0 }
  0xef   : > { %v506_v25 = vsel %vm442_vm3, %v378_v51, %v474_v17  ;;  %v1291_v51 = vld [vmem:[%s1852_s2 + $0xd4] sm:$0xf0]  ;;  %v1269_v17 = vld [vmem:[%s1852_s2 + $0x24] sm:$0xf0] }
  0xf0   : > { %v564_v29 = vpack.c.bf16 %v506_v25, %v505_v28  ;;  %v1221_v52 = vor.u32 %v1291_v51, %v1220_v50  ;;  %v1271_v28 = vld [vmem:[%s1852_s2 + $0x34] sm:$0xf0]  ;;  %v1230_v50 = vld [vmem:[%s1852_s2 + $0xe8] sm:$0xf0] }
  0xf4   : > { %v381_v53 = vpop.f32.mrf.mxu0 }
  0xf5   : > { %v475_v13 = vmul.f32 0.2, %v381_v53  ;;  %vm443_vm2 = vcmp.ge.f32.partialorder %v381_v53, 0.0 }
  0xf7   : > { %v507_v21 = vsel %vm443_vm2, %v381_v53, %v475_v13 }
  0xfc   : > { %v383_v55 = vpop.f32.mrf.mxu0 }
  0xfd   : > { %v476_v11 = vmul.f32 0.2, %v383_v55  ;;  %vm444_vm1 = vcmp.ge.f32.partialorder %v383_v55, 0.0 }
  0xff   : > { %v508_v18 = vsel %vm444_vm1, %v383_v55, %v476_v11  ;;  %v1124_v55 = vld [vmem:[%s1852_s2 + $0x10] sm:$0xf] }
 0x100   : > { %v565_v23 = vpack.c.bf16 %v508_v18, %v507_v21  ;;  %v1125_v62 = vor.u32 %v1267_v56, %v1124_v55  ;;  %v1264_v18 = vld [vmem:[%s1852_s2 + $0x4] sm:$0xf]  ;;  %v1150_v55 = vld [vmem:[%s1852_s2 + $0x48] sm:$0xf0] }
 0x104   : > { %v386_v0 = vpop.f32.mrf.mxu0 }
 0x105   : > { %v477_v9 = vmul.f32 0.2, %v386_v0  ;;  %vm445_vm15 = vcmp.ge.f32.partialorder %v386_v0, 0.0 }
 0x107   : > { %v509_v14 = vsel %vm445_vm15, %v386_v0, %v477_v9 }
 0x10c   : > { %v388_v10 = vpop.f32.mrf.mxu0 }
 0x10d   : > { %vm446_vm0 = vcmp.ge.f32.partialorder %v388_v10, 0.0  ;;  %v478_v12 = vmul.f32 0.2, %v388_v10 }
 0x10f   : > { %v510_v15 = vsel %vm446_vm0, %v388_v10, %v478_v12 }
 0x110   : > { %v566_v16 = vpack.c.bf16 %v510_v15, %v509_v14 }
 0x112   : > { %735 = vmatpush.bf16.msra.mxu1 %v566_v16  ;;  %1298 = vmatpush.bf16.msrb.mxu3 %v566_v16  ;;  %v1132_v16 = vld [vmem:[%s1852_s2 + $0x20] sm:$0xf] }
 0x113   : > { %v1133_v21 = vor.u32 %v1269_v17, %v1132_v16  ;;  %v1188_v17 = vld [vmem:[%s1852_s2 + $0x90] sm:$0xf] }
 0x114   : > { %v391_v22 = vpop.f32.mrf.mxu0 }
 0x115   : > { %v479_v31 = vmul.f32 0.2, %v391_v22  ;;  %vm447_vm7 = vcmp.ge.f32.partialorder %v391_v22, 0.0 }
 0x116   : > { %736 = vmatpush.bf16.msra.mxu1 %v565_v23  ;;  %1299 = vmatpush.bf16.msrb.mxu3 %v565_v23  ;;  %v1236_v23 = vld [vmem:[%s1852_s2 + $0xf0] sm:$0xf] }
 0x117   : > { %v511_v37 = vsel %vm447_vm7, %v391_v22, %v479_v31  ;;  %v1121_v22 = vor.u32 %v1264_v18, %v1118_v20  ;;  %v1237_v25 = vor.u32 %v1295_v24, %v1236_v23  ;;  %v1141_v31 = vor.u32 %v1271_v28, %v1140_v26  ;;  %v1283_v18 = vld [vmem:[%s1852_s2 + $0x94] sm:$0xf0]  ;;  %v1280_v24 = vld [vmem:[%s1852_s2 + $0x84] sm:$0xf]  ;;  %v1196_v28 = vld [vmem:[%s1852_s2 + $0xa0] sm:$0xf] }
 0x11a   : > { %737 = vmatpush.bf16.msra.mxu1 %v564_v29  ;;  %1300 = vmatpush.bf16.msrb.mxu3 %v564_v29  ;;  %v1266_v29 = vld [vmem:[%s1852_s2 + $0x14] sm:$0xf] }
 0x11b   : > { %v1129_v32 = vor.u32 %v1266_v29, %v1126_v30  ;;  %v1285_v29 = vld [vmem:[%s1852_s2 + $0xa4] sm:$0xf0] }
 0x11c   : > { %v393_v33 = vpop.f32.mrf.mxu0 }
 0x11d   : > { %vm448_vm8 = vcmp.ge.f32.partialorder %v393_v33, 0.0  ;;  %v480_v36 = vmul.f32 0.2, %v393_v33 }
 0x11e   : > { %738 = vmatpush.bf16.msra.mxu1 %v563_v34  ;;  %1301 = vmatpush.bf16.msrb.mxu3 %v563_v34  ;;  %v1214_v34 = vld [vmem:[%s1852_s2 + $0xc8] sm:$0xf0] }
 0x11f   : > { %v512_v38 = vsel %vm448_vm8, %v393_v33, %v480_v36  ;;  %v1288_v33 = vld [vmem:[%s1852_s2 + $0xc4] sm:$0xf] }
 0x120   : > { %v1551_v39 = vpack.c.bf16 %v512_v38, %v511_v37  ;;  %v1217_v36 = vor.u32 %v1288_v33, %v1214_v34  ;;  %v1148_v37 = vld [vmem:[%s1852_s2 + $0x40] sm:$0xf]  ;;  %v1273_v38 = vld [vmem:[%s1852_s2 + $0x44] sm:$0xf0] }
 0x122   : > { %739 = vmatpush.bf16.msra.mxu1 %v1534_v43  ;;  %1302 = vmatpush.bf16.msrb.mxu3 %v1534_v43 }
 0x124   : > { %v1555_v40 = vpop.f32.mrf.mxu0 }
 0x125   : > { %v481_v9 = vmul.f32 0.2, %v1555_v40  ;;  %vm449_vm0 = vcmp.ge.f32.partialorder %v1555_v40, 0.0 }
 0x126   : > { %740 = vmatpush.bf16.msra.mxu1 %v1530_v35  ;;  %1303 = vmatpush.bf16.msrb.mxu3 %v1530_v35  ;;  %v1212_v35 = vld [vmem:[%s1852_s2 + $0xc0] sm:$0xf] }
 0x127   : > { %v513_v14 = vsel %vm449_vm0, %v1555_v40, %v481_v9  ;;  %v1134_v40 = vld [vmem:[%s1852_s2 + $0x28] sm:$0xf0] }
 0x12a   : > { %741 = vmatpush.bf16.msra.mxu1 %v1526_v27  ;;  %1304 = vmatpush.bf16.msrb.mxu3 %v1526_v27  ;;  %v1289_v27 = vld [vmem:[%s1852_s2 + $0xc4] sm:$0xf0] }
 0x12b   : > { %v1213_v45 = vor.u32 %v1289_v27, %v1212_v35  ;;  %v1156_v27 = vld [vmem:[%s1852_s2 + $0x50] sm:$0xf] }
 0x12c   : > { %v398_v41 = vpop.f32.mrf.mxu0 }
 0x12d   : > { %vm450_vm15 = vcmp.ge.f32.partialorder %v398_v41, 0.0 }
 0x12e   : > { %742 = vmatpush.bf16.msra.mxu1 %v1522_v19  ;;  %1305 = vmatpush.bf16.msrb.mxu3 %v1522_v19  ;;  %v1116_v19 = vld [vmem:[%s1852_s2] sm:$0xf] }
 0x12f   : > { %v1117_v48 = vor.u32 %v1265_v47, %v1116_v19  ;;  %v1142_v19 = vld [vmem:[%s1852_s2 + $0x38] sm:$0xf0] }
 0x131   : > { %803 = vmatmul.bf16.vlgmr.msrb.gmra.mxu3 %v1213_v45  ;;  %743 = vmatmul.bf16.vlgmr.msra.gmra.mxu1 %v1117_v48  ;;  %v1275_v45 = vld [vmem:[%s1852_s2 + $0x54] sm:$0xf0] }
 0x132   : > { %1306 = vmatpush.bf16.msra.mxu3 %v1542_v63  ;;  %v1157_v47 = vor.u32 %v1275_v45, %v1156_v27 }
 0x134   : > { %v401_v42 = vpop.f32.mrf.mxu0 }
 0x135   : > { %v483_v2 = vmul.f32 0.2, %v401_v42  ;;  %vm451_vm14 = vcmp.ge.f32.partialorder %v401_v42, 0.0 }
 0x136   : > { %1307 = vmatpush.bf16.msra.mxu3 %v573_v5  ;;  %v482_v5 = vmul.f32 0.2, %v398_v41 }
 0x137   : > { %v515_v10 = vsel %vm451_vm14, %v401_v42, %v483_v2 }
 0x138   : > { %v514_v12 = vsel %vm450_vm15, %v398_v41, %v482_v5  ;;  %v1149_v41 = vor.u32 %v1273_v38, %v1148_v37  ;;  %v1276_v5 = vld [vmem:[%s1852_s2 + $0x64] sm:$0xf]  ;;  %v1282_v38 = vld [vmem:[%s1852_s2 + $0x94] sm:$0xf] }
 0x139   : > { %v568_v15 = vpack.c.bf16 %v514_v12, %v513_v14  ;;  %v1174_v14 = vld [vmem:[%s1852_s2 + $0x78] sm:$0xf0] }
 0x13a   : > { %1308 = vmatpush.bf16.msra.mxu3 %v572_v8  ;;  %v1293_v8 = vld [vmem:[%s1852_s2 + $0xe4] sm:$0xf0] }
 0x13b   : > { %v1229_v13 = vor.u32 %v1293_v8, %v1228_v7 }
 0x13c   : > { %v403_v43 = vpop.f32.mrf.mxu0 }
 0x13d   : > { %v484_v0 = vmul.f32 0.2, %v403_v43  ;;  %vm452_vm13 = vcmp.ge.f32.partialorder %v403_v43, 0.0 }
 0x13f   : > { %v516_v6 = vsel %vm452_vm13, %v403_v43, %v484_v0  ;;  %v1290_v43 = vld [vmem:[%s1852_s2 + $0xd4] sm:$0xf]  ;;  %v1158_v0 = vld [vmem:[%s1852_s2 + $0x58] sm:$0xf0] }
 0x140   : > { %v569_v11 = vpack.c.bf16 %v516_v6, %v515_v10  ;;  %v1166_v6 = vld [vmem:[%s1852_s2 + $0x68] sm:$0xf0] }
 0x141   : > { %808 = vmatmul.bf16.gmra.mxu3 %v1221_v52  ;;  %748 = vmatmul.bf16.gmra.mxu1 %v1125_v62  ;;  %v1164_v52 = vld [vmem:[%s1852_s2 + $0x60] sm:$0xf]  ;;  %v1279_v62 = vld [vmem:[%s1852_s2 + $0x74] sm:$0xf0]  ;;  %v1169_v10 = vor.u32 %v1276_v5, %v1166_v6 }
 0x144   : > { %v406_v44 = vpop.f32.mrf.mxu0 }
 0x145   : > { %v485_v59 = vmul.f32 0.2, %v406_v44  ;;  %vm453_vm12 = vcmp.ge.f32.partialorder %v406_v44, 0.0 }
 0x147   : > { %v517_v3 = vsel %vm453_vm12, %v406_v44, %v485_v59  ;;  %v1222_v44 = vld [vmem:[%s1852_s2 + $0xd8] sm:$0xf0] }
 0x148   : > { %v1225_v35 = vor.u32 %v1290_v43, %v1222_v44  ;;  %v1238_v59 = vld [vmem:[%s1852_s2 + $0xf8] sm:$0xf0] }
 0x14c   : > { %v408_v46 = vpop.f32.mrf.mxu0 }
 0x14d   : > { %v486_v57 = vmul.f32 0.2, %v408_v46  ;;  %vm454_vm11 = vcmp.ge.f32.partialorder %v408_v46, 0.0 }
 0x14f   : > { %v518_v1 = vsel %vm454_vm11, %v408_v46, %v486_v57  ;;  %v1270_v46 = vld [vmem:[%s1852_s2 + $0x34] sm:$0xf] }
 0x150   : > { %v570_v4 = vpack.c.bf16 %v518_v1, %v517_v3  ;;  %v1145_v48 = vor.u32 %v1270_v46, %v1142_v19  ;;  %v1180_v3 = vld [vmem:[%s1852_s2 + $0x80] sm:$0xf] }
 0x151   : > { %813 = vmatmul.bf16.gmra.mxu3 %v1229_v13  ;;  %753 = vmatmul.bf16.gmra.mxu1 %v1133_v21  ;;  %v1278_v13 = vld [vmem:[%s1852_s2 + $0x74] sm:$0xf]  ;;  %v1189_v21 = vor.u32 %v1283_v18, %v1188_v17 }
 0x152   : > { %v1177_v20 = vor.u32 %v1278_v13, %v1174_v14 }
 0x154   : > { %v411_v49 = vpop.f32.mrf.mxu0 }
 0x155   : > { %v487_v53 = vmul.f32 0.2, %v411_v49  ;;  %vm455_vm9 = vcmp.ge.f32.partialorder %v411_v49, 0.0 }
 0x157   : > { %v519_v61 = vsel %vm455_vm9, %v411_v49, %v487_v53  ;;  %v1292_v49 = vld [vmem:[%s1852_s2 + $0xe4] sm:$0xf]  ;;  %v1277_v53 = vld [vmem:[%s1852_s2 + $0x64] sm:$0xf0] }
 0x158   : > { %v1233_v51 = vor.u32 %v1292_v49, %v1230_v50  ;;  %v1165_v56 = vor.u32 %v1277_v53, %v1164_v52  ;;  %v1198_v49 = vld [vmem:[%s1852_s2 + $0xa8] sm:$0xf0] }
 0x15c   : > { %v413_v54 = vpop.f32.mrf.mxu0 }
 0x15d   : > { %vm456_vm10 = vcmp.ge.f32.partialorder %v413_v54, 0.0  ;;  %v488_v58 = vmul.f32 0.2, %v413_v54 }
 0x15f   : > { %v520_v60 = vsel %vm456_vm10, %v413_v54, %v488_v58  ;;  %v1272_v54 = vld [vmem:[%s1852_s2 + $0x44] sm:$0xf]  ;;  %v1294_v58 = vld [vmem:[%s1852_s2 + $0xf4] sm:$0xf] }
 0x160   : > { %v571_v63 = vpack.c.bf16 %v520_v60, %v519_v61  ;;  %v1153_v57 = vor.u32 %v1272_v54, %v1150_v55  ;;  %v1241_v60 = vor.u32 %v1294_v58, %v1238_v59  ;;  %v1172_v61 = vld [vmem:[%s1852_s2 + $0x70] sm:$0xf] }
 0x161   : > { %818 = vmatmul.bf16.gmra.mxu3 %v1237_v25  ;;  %758 = vmatmul.bf16.gmra.mxu1 %v1141_v31  ;;  %v1173_v1 = vor.u32 %v1279_v62, %v1172_v61  ;;  %v1182_v25 = vld [vmem:[%s1852_s2 + $0x88] sm:$0xf0]  ;;  %v1197_v31 = vor.u32 %v1285_v29, %v1196_v28  ;;  %v1286_v61 = vld [vmem:[%s1852_s2 + $0xb4] sm:$0xf]  ;;  %v1206_v62 = vld [vmem:[%s1852_s2 + $0xb8] sm:$0xf0] }
 0x162   : > { %827 = vmatpush.bf16.msra.mxu2 %v571_v63  ;;  %1309 = vmatpush.bf16.msra.mxu3 %v571_v63  ;;  %v1274_v63 = vld [vmem:[%s1852_s2 + $0x54] sm:$0xf]  ;;  %v1185_v30 = vor.u32 %v1280_v24, %v1182_v25 }
 0x163   : > { %v1161_v2 = vor.u32 %v1274_v63, %v1158_v0 }
 0x166   : > { %828 = vmatpush.bf16.msra.mxu2 %v570_v4  ;;  %1310 = vmatpush.bf16.msra.mxu3 %v570_v4  ;;  %v1281_v4 = vld [vmem:[%s1852_s2 + $0x84] sm:$0xf0] }
 0x167   : > { %v1181_v7 = vor.u32 %v1281_v4, %v1180_v3 }
 0x16a   : > { %829 = vmatpush.bf16.msra.mxu2 %v569_v11  ;;  %1311 = vmatpush.bf16.msra.mxu3 %v569_v11 }
 0x16e   : > { %830 = vmatpush.bf16.msra.mxu2 %v568_v15  ;;  %1312 = vmatpush.bf16.msra.mxu3 %v568_v15 }
 0x171   : > { %763 = vmatmul.bf16.gmra.mxu1 %v1149_v41  ;;  %v1204_v41 = vld [vmem:[%s1852_s2 + $0xb0] sm:$0xf] }
 0x172   : > { %831 = vmatpush.bf16.msra.mxu2 %v1551_v39  ;;  %1313 = vmatpush.bf16.msra.mxu3 %v1551_v39  ;;  %v1268_v39 = vld [vmem:[%s1852_s2 + $0x24] sm:$0xf] }
 0x173   : > { %v1137_v42 = vor.u32 %v1268_v39, %v1134_v40  ;;  %v1190_v39 = vld [vmem:[%s1852_s2 + $0x98] sm:$0xf0] }
 0x174   : > { %v1193_v44 = vor.u32 %v1282_v38, %v1190_v39 }
 0x175   : > { %832 = vmatmul.bf16.vlgmr.msra.gmra.mxu2 %v1121_v22  ;;  %892 = vmatmul.bf16.vlgmr.msra.gmra.mxu3 %v1217_v36 }
 0x181   : > { %768 = vmatmul.bf16.gmra.mxu1 %v1157_v47 }
 0x185   : > { %837 = vmatmul.bf16.gmra.mxu2 %v1129_v32  ;;  %897 = vmatmul.bf16.gmra.mxu3 %v1225_v35 }
 0x191   : > { %773 = vmatmul.bf16.gmra.mxu1 %v1165_v56 }
 0x195   : > { %842 = vmatmul.bf16.gmra.mxu2 %v1137_v42  ;;  %902 = vmatmul.bf16.gmra.mxu3 %v1233_v51  ;;  %v1287_v42 = vld [vmem:[%s1852_s2 + $0xb4] sm:$0xf0] }
 0x196   : > { %v1205_v27 = vor.u32 %v1287_v42, %v1204_v41 }
 0x1a1   : > { %778 = vmatmul.bf16.gmra.mxu1 %v1173_v1  ;;  %v1209_v1 = vor.u32 %v1286_v61, %v1206_v62 }
 0x1a5   : > { %847 = vmatmul.bf16.gmra.mxu2 %v1145_v48  ;;  %907 = vmatmul.bf16.gmra.mxu3 %v1241_v60  ;;  %v1284_v48 = vld [vmem:[%s1852_s2 + $0xa4] sm:$0xf] }
 0x1a6   : > { %v1201_v53 = vor.u32 %v1284_v48, %v1198_v49 }
 0x1ae   : > { %v744_v8 = vpop.f32.mrf.mxu1 }
 0x1b1   : > { %783 = vmatmul.bf16.gmra.mxu1 %v1181_v7 }
 0x1b4   : > { %v804_v9 = vpop.f32.mrf.mxu3 }
 0x1b5   : > { %852 = vmatmul.bf16.gmra.mxu2 %v1153_v57 }
 0x1b6   : > { %v746_v11 = vpop.f32.mrf.mxu1 }
 0x1bc   : > { %v1713_v12 = vpop.f32.mrf.mxu3 }
 0x1be   : > { %v749_v15 = vpop.f32.mrf.mxu1 }
 0x1c1   : > { %788 = vmatmul.bf16.gmra.mxu1 %v1189_v21 }
 0x1c4   : > { %v1721_v16 = vpop.f32.mrf.mxu3 }
 0x1c5   : > { %857 = vmatmul.bf16.gmra.mxu2 %v1161_v2 }
 0x1c6   : > { %v751_v22 = vpop.f32.mrf.mxu1 }
 0x1cc   : > { %v1729_v23 = vpop.f32.mrf.mxu3 }
 0x1ce   : > { %v754_v32 = vpop.f32.mrf.mxu1 }
 0x1d1   : > { %793 = vmatmul.bf16.gmra.mxu1 %v1197_v31 }
 0x1d4   : > { %v1737_v26 = vpop.f32.mrf.mxu3 }
 0x1d5   : > { %862 = vmatmul.bf16.gmra.mxu2 %v1169_v10 }
 0x1d6   : > { %v756_v37 = vpop.f32.mrf.mxu1 }
 0x1dc   : > { %v1748_v36 = vpop.f32.mrf.mxu3 }
 0x1de   : > { %v759_v45 = vpop.f32.mrf.mxu1 }
 0x1e1   : > { %798 = vmatmul.bf16.gmra.mxu1 %v1205_v27 }
 0x1e4   : > { %v1765_v35 = vpop.f32.mrf.mxu3 }
 0x1e5   : > { %867 = vmatmul.bf16.gmra.mxu2 %v1177_v20 }
 0x1e6   : > { %v761_v51 = vpop.f32.mrf.mxu1 }
 0x1ec   : > { %v821_v47 = vpop.f32.mrf.mxu3 }
 0x1ee   : > { %v764_v59 = vpop.f32.mrf.mxu1 }
 0x1f5   : > { %872 = vmatmul.bf16.gmra.mxu2 %v1185_v30 }
 0x1f6   : > { %v766_v4 = vpop.f32.mrf.mxu1 }
 0x1f8   : > { %v833_v33 = vpop.f32.mrf.mxu2  ;;  %v893_v54 = vpop.f32.mrf.mxu3 }
 0x1f9   : > { %v834_v34 = vadd.f32 %v833_v33, %v744_v8  ;;  %v894_v55 = vadd.f32 %v893_v54, %v804_v9 }
 0x1fb   : > { %913 = vst [vmem:[%s1750_s10] sm:$0xff] %v834_v34 }
 0x1fc   : > { %937 = vst [vmem:[%s1750_s10 + $0xc0] sm:$0xff] %v894_v55 }
 0x1fe   : > { %v769_v9 = vpop.f32.mrf.mxu1 }
 0x200   : > { %v835_v40 = vpop.f32.mrf.mxu2  ;;  %v895_v58 = vpop.f32.mrf.mxu3 }
 0x201   : > { %v836_v43 = vadd.f32 %v835_v40, %v746_v11  ;;  %v896_v60 = vadd.f32 %v895_v58, %v1713_v12 }
 0x203   : > { %914 = vst [vmem:[%s1750_s10 + $0x8] sm:$0xff] %v836_v43 }
 0x204   : > { %938 = vst [vmem:[%s1750_s10 + $0xc8] sm:$0xff] %v896_v60 }
 0x205   : > { %877 = vmatmul.bf16.gmra.mxu2 %v1193_v44 }
 0x208   : > { %v838_v46 = vpop.f32.mrf.mxu2  ;;  %v898_v2 = vpop.f32.mrf.mxu3 }
 0x209   : > { %v839_v19 = vadd.f32 %v838_v46, %v749_v15  ;;  %v899_v3 = vadd.f32 %v898_v2, %v1721_v16  ;;  %v771_v15 = vpop.f32.mrf.mxu1 }
 0x20b   : > { %915 = vst [vmem:[%s1750_s10 + $0x10] sm:$0xff] %v839_v19 }
 0x20c   : > { %939 = vst [vmem:[%s1750_s10 + $0xd0] sm:$0xff] %v899_v3 }
 0x210   : > { %v840_v50 = vpop.f32.mrf.mxu2  ;;  %v900_v7 = vpop.f32.mrf.mxu3 }
 0x211   : > { %v841_v52 = vadd.f32 %v840_v50, %v751_v22  ;;  %v901_v8 = vadd.f32 %v900_v7, %v1729_v23  ;;  %v774_v23 = vpop.f32.mrf.mxu1 }
 0x213   : > { %916 = vst [vmem:[%s1750_s10 + $0x18] sm:$0xff] %v841_v52 }
 0x214   : > { %940 = vst [vmem:[%s1750_s10 + $0xd8] sm:$0xff] %v901_v8 }
 0x215   : > { %882 = vmatmul.bf16.gmra.mxu2 %v1201_v53 }
 0x218   : > { %v843_v56 = vpop.f32.mrf.mxu2  ;;  %v903_v12 = vpop.f32.mrf.mxu3 }
 0x219   : > { %v844_v57 = vadd.f32 %v843_v56, %v754_v32  ;;  %v904_v13 = vadd.f32 %v903_v12, %v1737_v26  ;;  %v776_v30 = vpop.f32.mrf.mxu1 }
 0x21b   : > { %917 = vst [vmem:[%s1750_s10 + $0x20] sm:$0xff] %v844_v57 }
 0x21c   : > { %941 = vst [vmem:[%s1750_s10 + $0xe0] sm:$0xff] %v904_v13 }
 0x220   : > { %v845_v63 = vpop.f32.mrf.mxu2  ;;  %v905_v17 = vpop.f32.mrf.mxu3 }
 0x221   : > { %v846_v0 = vadd.f32 %v845_v63, %v756_v37  ;;  %v906_v18 = vadd.f32 %v905_v17, %v1748_v36  ;;  %v779_v33 = vpop.f32.mrf.mxu1 }
 0x223   : > { %918 = vst [vmem:[%s1750_s10 + $0x28] sm:$0xff] %v846_v0 }
 0x224   : > { %942 = vst [vmem:[%s1750_s10 + $0xe8] sm:$0xff] %v906_v18 }
 0x225   : > { %887 = vmatmul.bf16.gmra.mxu2 %v1209_v1 }
 0x228   : > { %v848_v5 = vpop.f32.mrf.mxu2  ;;  %v908_v22 = vpop.f32.mrf.mxu3 }
 0x229   : > { %v849_v6 = vadd.f32 %v848_v5, %v759_v45  ;;  %v909_v24 = vadd.f32 %v908_v22, %v1765_v35  ;;  %v781_v38 = vpop.f32.mrf.mxu1 }
 0x22b   : > { %919 = vst [vmem:[%s1750_s10 + $0x30] sm:$0xff] %v849_v6 }
 0x22c   : > { %943 = vst [vmem:[%s1750_s10 + $0xf0] sm:$0xff] %v909_v24 }
 0x230   : > { %v850_v10 = vpop.f32.mrf.mxu2  ;;  %v910_v28 = vpop.f32.mrf.mxu3 }
 0x231   : > { %v851_v11 = vadd.f32 %v850_v10, %v761_v51  ;;  %v911_v29 = vadd.f32 %v910_v28, %v821_v47  ;;  %v784_v42 = vpop.f32.mrf.mxu1 }
 0x233   : > { %920 = vst [vmem:[%s1750_s10 + $0x38] sm:$0xff] %v851_v11 }
 0x234   : > { %944 = vst [vmem:[%s1750_s10 + $0xf8] sm:$0xff] %v911_v29 }
 0x238   : > { %v853_v14 = vpop.f32.mrf.mxu2 }
 0x239   : > { %v854_v16 = vadd.f32 %v853_v14, %v764_v59  ;;  %v786_v35 = vpop.f32.mrf.mxu1 }
 0x23b   : > { %921 = vst [vmem:[%s1750_s10 + $0x40] sm:$0xff] %v854_v16 }
 0x240   : > { %v855_v20 = vpop.f32.mrf.mxu2 }
 0x241   : > { %v856_v21 = vadd.f32 %v855_v20, %v766_v4  ;;  %v789_v46 = vpop.f32.mrf.mxu1 }
 0x243   : > { %922 = vst [vmem:[%s1750_s10 + $0x48] sm:$0xff] %v856_v21 }
 0x248   : > { %v858_v25 = vpop.f32.mrf.mxu2 }
 0x249   : > { %v859_v26 = vadd.f32 %v858_v25, %v769_v9  ;;  %v791_v48 = vpop.f32.mrf.mxu1 }
 0x24b   : > { %923 = vst [vmem:[%s1750_s10 + $0x50] sm:$0xff] %v859_v26 }
 0x250   : > { %v860_v31 = vpop.f32.mrf.mxu2 }
 0x251   : > { %v861_v32 = vadd.f32 %v860_v31, %v771_v15  ;;  %v794_v53 = vpop.f32.mrf.mxu1 }
 0x253   : > { %924 = vst [vmem:[%s1750_s10 + $0x58] sm:$0xff] %v861_v32 }
 0x258   : > { %v863_v34 = vpop.f32.mrf.mxu2 }
 0x259   : > { %v864_v36 = vadd.f32 %v863_v34, %v774_v23  ;;  %v796_v56 = vpop.f32.mrf.mxu1 }
 0x25b   : > { %925 = vst [vmem:[%s1750_s10 + $0x60] sm:$0xff] %v864_v36 }
 0x260   : > { %v865_v37 = vpop.f32.mrf.mxu2 }
 0x261   : > { %v866_v39 = vadd.f32 %v865_v37, %v776_v30  ;;  %v799_v59 = vpop.f32.mrf.mxu1 }
 0x263   : > { %926 = vst [vmem:[%s1750_s10 + $0x68] sm:$0xff] %v866_v39 }
 0x268   : > { %v868_v40 = vpop.f32.mrf.mxu2 }
 0x269   : > { %v869_v41 = vadd.f32 %v868_v40, %v779_v33  ;;  %v801_v62 = vpop.f32.mrf.mxu1 }
 0x26b   : > { %927 = vst [vmem:[%s1750_s10 + $0x70] sm:$0xff] %v869_v41 }
 0x270   : > { %v870_v43 = vpop.f32.mrf.mxu2 }
 0x271   : > { %v871_v44 = vadd.f32 %v870_v43, %v781_v38 }
 0x273   : > { %928 = vst [vmem:[%s1750_s10 + $0x78] sm:$0xff] %v871_v44 }
 0x278   : > { %v873_v27 = vpop.f32.mrf.mxu2 }
 0x279   : > { %v874_v45 = vadd.f32 %v873_v27, %v784_v42 }
 0x27b   : > { %929 = vst [vmem:[%s1750_s10 + $0x80] sm:$0xff] %v874_v45 }
 0x280   : > { %v875_v19 = vpop.f32.mrf.mxu2 }
 0x281   : > { %v876_v47 = vadd.f32 %v875_v19, %v786_v35 }
 0x283   : > { %930 = vst [vmem:[%s1750_s10 + $0x88] sm:$0xff] %v876_v47 }
 0x288   : > { %v878_v49 = vpop.f32.mrf.mxu2 }
 0x289   : > { %v879_v50 = vadd.f32 %v878_v49, %v789_v46 }
 0x28b   : > { %931 = vst [vmem:[%s1750_s10 + $0x90] sm:$0xff] %v879_v50 }
 0x290   : > { %v880_v51 = vpop.f32.mrf.mxu2 }
 0x291   : > { %v881_v52 = vadd.f32 %v880_v51, %v791_v48 }
 0x293   : > { %932 = vst [vmem:[%s1750_s10 + $0x98] sm:$0xff] %v881_v52 }
 0x298   : > { %v883_v54 = vpop.f32.mrf.mxu2 }
 0x299   : > { %v884_v55 = vadd.f32 %v883_v54, %v794_v53 }
 0x29b   : > { %933 = vst [vmem:[%s1750_s10 + $0xa0] sm:$0xff] %v884_v55 }
 0x2a0   : > { %v885_v57 = vpop.f32.mrf.mxu2 }
 0x2a1   : > { %v886_v58 = vadd.f32 %v885_v57, %v796_v56 }
 0x2a3   : > { %934 = vst [vmem:[%s1750_s10 + $0xa8] sm:$0xff] %v886_v58 }
 0x2a8   : > { %v888_v60 = vpop.f32.mrf.mxu2 }
 0x2a9   : > { %v889_v61 = vadd.f32 %v888_v60, %v799_v59 }
 0x2ab   : > { %935 = vst [vmem:[%s1750_s10 + $0xb0] sm:$0xff] %v889_v61 }
 0x2b0   : > { %v890_v63 = vpop.f32.mrf.mxu2 }
 0x2b1   : > { %v891_v0 = vadd.f32 %v890_v63, %v801_v62 }
 0x2b3   : > { %936 = vst [vmem:[%s1750_s10 + $0xb8] sm:$0xff] %v891_v0 }
 0x2b4   : > { %1382 = shalt.err (!%p1379_p3)
}
 0x2b5   : > { %s1419_s8 = smov 128   ;;  %s1420_s10 = smov 8  }
 0x2b6   : > { %1314 = dma.vmem_to_hbm [thread:$0]  (%p1479_p5), %s959_s24, 4096, %s961_s25, %s946_s26, %s1419_s8, %s1419_s8, %s1420_s10  }
 0x2b7 PF: > { %p1320_p4 = scmp.ge.s32.totalorder %s1417_s15, 2  ;;  %s975_s6 = sand.u32 1, %s1405_s12  }
 0x2b8   : > { %s976_s7 = scalar_lea.sflag [#allocation3], %s975_s6 }
 0x2b9   : > { %p1317_p7 = pnand %p1320_p4, %p1483_p6 }
 0x2bb   : > { %p1318_p8 = pneg %p1317_p7 }
 0x2bd   : > { %1400 = dma.done.wait (%p1318_p8), %s976_s7, 4096  }
 0x2be   : > { %1402 = vsyncadd (%p1318_p8), %s976_s7, 4294963200  ;;  %p13_p9 = scmp.ge.s32.totalorder %s1466_s18, 4   ;;  %s1856_s12 = smov %s1409_s13 }
 0x2bf   : > { %s1857_s13 = smov %s1413_s14  ;;  %s1858_s14 = smov %s1477_s21 }
 0x2c0   : > { %s1859_s15 = smov %s1466_s18  ;;  %15 = sbr.rel (!%p13_p9) target bundleno = 3 (0x3), region = 67 }
 0x2c5   :  { %982 = vsyncpa [#allocation3], 1 }
 0x2c6   :  { %984 = vsyncpa [#allocation3 + $0x1], 1 }

</bundles_post_ra>
